<compile_context>
chip_gen: v6e
topology: v6e:2x2x1
jax: 0.10.0
libtpu: 0.0.40
codegen_flags: <defaults>
</compile_context>

<pallas_src>
import functools

import jax
import jax.numpy as jnp
from jax.experimental import pallas as pl
from jax.experimental.pallas import tpu as pltpu


def lstm_step_kernel(x_ref, wih_ref, whh_ref, b_ref, h_out_ref,
                     h_scr, c_scr, *, hidden):
    """One LSTM timestep for one batch tile.

    x_ref  : (1, TB, D)   bf16   current timestep's inputs
    wih_ref: (D, 4H)      bf16   input->gates weights (transposed, resident)
    whh_ref: (H, 4H)      bf16   hidden->gates weights (transposed, resident)
    b_ref  : (1, 4H)      f32    b_ih + b_hh (resident)
    h_out  : (TB, H)      f32    final hidden state (written at t == T-1)
    h_scr  : (TB, H)      f32    recurrent hidden state (scratch)
    c_scr  : (TB, H)      f32    recurrent cell state   (scratch)
    """
    t = pl.program_id(1)

    @pl.when(t == 0)
    def _init():
        h_scr[...] = jnp.zeros_like(h_scr)
        c_scr[...] = jnp.zeros_like(c_scr)

    x_t = x_ref[0]                                   # (TB, D) bf16
    h_prev = h_scr[...]                              # (TB, H) f32

    # gates = x_t @ W_ih^T + h_{t-1} @ W_hh^T + (b_ih + b_hh), f32 accumulation.
    gates = (
        jnp.dot(x_t, wih_ref[...], preferred_element_type=jnp.float32)
        + jnp.dot(h_prev.astype(jnp.bfloat16), whh_ref[...],
                  preferred_element_type=jnp.float32)
        + b_ref[...]
    )                                                # (TB, 4H) f32

    i_g = jax.nn.sigmoid(gates[:, 0 * hidden:1 * hidden])
    f_g = jax.nn.sigmoid(gates[:, 1 * hidden:2 * hidden])
    g_g = jnp.tanh(gates[:, 2 * hidden:3 * hidden])
    o_g = jax.nn.sigmoid(gates[:, 3 * hidden:4 * hidden])

    c_new = f_g * c_scr[...] + i_g * g_g
    h_new = o_g * jnp.tanh(c_new)

    c_scr[...] = c_new
    h_scr[...] = h_new

    @pl.when(t == pl.num_programs(1) - 1)
    def _finalize():
        h_out_ref[...] = h_new.astype(h_out_ref.dtype)


def dynamic_lstm_fusion(x, w_ih, w_hh, b_ih, b_hh, *, batch_tile=8):
    """Fused forward of DynamicLSTMFusion: returns hidden[-1] of shape (B, H).

    x    : (B, T, D) f32 (batch_first, like the PyTorch module)
    w_ih : (4H, D), w_hh : (4H, H), b_ih/b_hh : (4H,)  -- PyTorch layout.
    """
    B, T, D = x.shape
    four_h = w_ih.shape[0]
    H = four_h // 4

    TB = min(batch_tile, B)
    assert B % TB == 0, "batch must be a multiple of the batch tile"

    # Time-major layout so each per-step block (1, TB, D) is (sublane, lane)
    # aligned; cast the streamed/matmul operands to bf16 (f32 accumulation
    # happens inside the kernel).
    x_tm = jnp.transpose(x, (1, 0, 2)).astype(jnp.bfloat16)      # (T, B, D)
    wih_t = jnp.transpose(w_ih).astype(jnp.bfloat16)             # (D, 4H)
    whh_t = jnp.transpose(w_hh).astype(jnp.bfloat16)             # (H, 4H)
    bias = (b_ih + b_hh).astype(jnp.float32).reshape(1, four_h)  # (1, 4H)

    grid = (B // TB, T)

    cost = pl.CostEstimate(
        flops=2 * T * B * (D + H) * four_h + 10 * T * B * H,
        transcendentals=5 * T * B * H,
        bytes_accessed=(x_tm.size * 2 + wih_t.size * 2 + whh_t.size * 2
                        + bias.size * 4 + B * H * 4),
    )

    kernel = functools.partial(lstm_step_kernel, hidden=H)

    return pl.pallas_call(
        kernel,
        out_shape=jax.ShapeDtypeStruct((B, H), jnp.float32),
        grid=grid,
        in_specs=[
            # streamed per timestep (double-buffered by the Pallas pipeline)
            pl.BlockSpec((1, TB, D), lambda b, t: (t, b, 0)),
            # resident operands: constant block index across the whole grid
            pl.BlockSpec((D, four_h), lambda b, t: (0, 0)),
            pl.BlockSpec((H, four_h), lambda b, t: (0, 0)),
            pl.BlockSpec((1, four_h), lambda b, t: (0, 0)),
        ],
        # Output block is resident across the (sequential) time axis and only
        # stored on the last timestep.
        out_specs=pl.BlockSpec((TB, H), lambda b, t: (b, 0)),
        scratch_shapes=[
            pltpu.VMEM((TB, H), jnp.float32),   # h state
            pltpu.VMEM((TB, H), jnp.float32),   # c state
        ],
        compiler_params=pltpu.CompilerParams(
            dimension_semantics=("parallel", "arbitrary"),
            vmem_limit_bytes=32 * 1024 * 1024,
        ),
        cost_estimate=cost,
    )(x_tm, wih_t, whh_t, bias)


def reference_lstm_last_hidden(x, w_ih, w_hh, b_ih, b_hh):
    """Pure-JAX f32 reference matching nn.LSTM(batch_first=True) -> hidden[-1]."""
    B, T, _ = x.shape
    H = w_hh.shape[1]
    h = jnp.zeros((B, H), jnp.float32)
    c = jnp.zeros((B, H), jnp.float32)
    for t in range(T):
        gates = x[:, t] @ w_ih.T + h @ w_hh.T + b_ih + b_hh
        i_g = jax.nn.sigmoid(gates[:, 0 * H:1 * H])
        f_g = jax.nn.sigmoid(gates[:, 1 * H:2 * H])
        g_g = jnp.tanh(gates[:, 2 * H:3 * H])
        o_g = jax.nn.sigmoid(gates[:, 3 * H:4 * H])
        c = f_g * c + i_g * g_g
        h = o_g * jnp.tanh(c)
    return h


if __name__ == "__main__":
    key = jax.random.PRNGKey(0)
    k_x, k_wih, k_whh, k_bih, k_bhh = jax.random.split(key, 5)

    # Small, TPU-friendly shapes: batch=8, seq=8, input_dim=128, hidden_dim=128
    # (H=128 keeps each gate slice exactly one lane tile; B=8 fills sublanes).
    B, T, D, H = 8, 8, 128, 128

    x = jax.random.normal(k_x, (B, T, D), jnp.float32)

    # PyTorch nn.LSTM default init: U(-1/sqrt(H), 1/sqrt(H)) for all params.
    lim = 1.0 / (H ** 0.5)
    w_ih = jax.random.uniform(k_wih, (4 * H, D), jnp.float32, -lim, lim)
    w_hh = jax.random.uniform(k_whh, (4 * H, H), jnp.float32, -lim, lim)
    b_ih = jax.random.uniform(k_bih, (4 * H,), jnp.float32, -lim, lim)
    b_hh = jax.random.uniform(k_bhh, (4 * H,), jnp.float32, -lim, lim)

    out = dynamic_lstm_fusion(x, w_ih, w_hh, b_ih, b_hh)
    out = jax.block_until_ready(out)

    ref = jax.block_until_ready(
        reference_lstm_last_hidden(x, w_ih, w_hh, b_ih, b_hh))

    assert out.shape == (B, H)
    # Tolerance loosened slightly vs pure-f32 because matmul operands are bf16
    # (accumulation stays f32).
    assert jnp.allclose(out, ref, rtol=3e-2, atol=3e-2), "mismatch vs JAX reference"

    print("KERNEL_OK")
</pallas_src>

<mosaic_0001>
module attributes {stable_mosaic.version = 11 : i64} {
  func.func @lstm_step_kernel(%arg0: i32, %arg1: i32, %arg2: memref<1x8x128xbf16, #tpu.memory_space<vmem>>, %arg3: memref<128x512xbf16, #tpu.memory_space<vmem>>, %arg4: memref<128x512xbf16, #tpu.memory_space<vmem>>, %arg5: memref<1x512xf32, #tpu.memory_space<vmem>>, %arg6: memref<8x128xf32, #tpu.memory_space<vmem>>, %arg7: memref<8x128xf32, #tpu.memory_space<vmem>>, %arg8: memref<8x128xf32, #tpu.memory_space<vmem>>) attributes {dimension_semantics = [#tpu.dimension_semantics<parallel>, #tpu.dimension_semantics<arbitrary>], iteration_bounds = array<i64: 1, 8>, scalar_prefetch = 0 : i64, scratch_operands = 2 : i64, tpu.core_type = #tpu.core_type<tc>, window_params = [{transform_indices = @transform_0, window_bounds = array<i64: 1, 8, 128>}, {pipeline_mode = #tpu.pipeline_mode<synchronous>, transform_indices = @transform_1, window_bounds = array<i64: 128, 512>}, {pipeline_mode = #tpu.pipeline_mode<synchronous>, transform_indices = @transform_2, window_bounds = array<i64: 128, 512>}, {pipeline_mode = #tpu.pipeline_mode<synchronous>, transform_indices = @transform_3, window_bounds = array<i64: 1, 512>}, {transform_indices = @transform_4, window_bounds = array<i64: 8, 128>}]} {
    %c0_i32 = arith.constant 0 : i32
    %0 = arith.cmpi eq, %arg1, %c0_i32 : i32
    %1 = arith.extui %0 : i1 to i32
    %c0_i32_0 = arith.constant 0 : i32
    %2 = arith.cmpi ne, %1, %c0_i32_0 : i32
    scf.if %2 {
      %cst_22 = arith.constant 0.000000e+00 : f32
      %46 = vector.broadcast %cst_22 : f32 to vector<8x128xf32>
      %c0_23 = arith.constant 0 : index
      %c0_24 = arith.constant 0 : index
      %47 = vector.load %arg7[%c0_23, %c0_24] : memref<8x128xf32, #tpu.memory_space<vmem>>, vector<8x128xf32>
      tpu.vector_store %arg7[%c0_23, %c0_24], %46 {strides = array<i32>} : memref<8x128xf32, #tpu.memory_space<vmem>>, vector<8x128xf32>,
      %cst_25 = arith.constant 0.000000e+00 : f32
      %48 = vector.broadcast %cst_25 : f32 to vector<8x128xf32>
      %c0_26 = arith.constant 0 : index
      %c0_27 = arith.constant 0 : index
      %49 = vector.load %arg8[%c0_26, %c0_27] : memref<8x128xf32, #tpu.memory_space<vmem>>, vector<8x128xf32>
      tpu.vector_store %arg8[%c0_26, %c0_27], %48 {strides = array<i32>} : memref<8x128xf32, #tpu.memory_space<vmem>>, vector<8x128xf32>,
    } else {
    }
    %c0 = arith.constant 0 : index
    %c0_1 = arith.constant 0 : index
    %c0_2 = arith.constant 0 : index
    %3 = vector.load %arg2[%c0, %c0_1, %c0_2] : memref<1x8x128xbf16, #tpu.memory_space<vmem>>, vector<1x8x128xbf16>
    %4 = vector.shape_cast %3 : vector<1x8x128xbf16> to vector<8x128xbf16>
    %c0_3 = arith.constant 0 : index
    %c0_4 = arith.constant 0 : index
    %5 = vector.load %arg7[%c0_3, %c0_4] : memref<8x128xf32, #tpu.memory_space<vmem>>, vector<8x128xf32>
    %c0_5 = arith.constant 0 : index
    %c0_6 = arith.constant 0 : index
    %6 = vector.load %arg3[%c0_5, %c0_6] : memref<128x512xbf16, #tpu.memory_space<vmem>>, vector<128x512xbf16>
    %cst = arith.constant dense<0.000000e+00> : vector<8x512xf32>
    %7 = tpu.matmul %4, %6, %cst {dimension_numbers = #tpu.dot_dimension_numbers<[1], [0], [0], [1], [0, 0, 1, 1], [], []>} : vector<8x128xbf16>, vector<128x512xbf16>, vector<8x512xf32> -> vector<8x512xf32>
    %8 = arith.truncf %5 : vector<8x128xf32> to vector<8x128xbf16>
    %c0_7 = arith.constant 0 : index
    %c0_8 = arith.constant 0 : index
    %9 = vector.load %arg4[%c0_7, %c0_8] : memref<128x512xbf16, #tpu.memory_space<vmem>>, vector<128x512xbf16>
    %cst_9 = arith.constant dense<0.000000e+00> : vector<8x512xf32>
    %10 = tpu.matmul %8, %9, %cst_9 {dimension_numbers = #tpu.dot_dimension_numbers<[1], [0], [0], [1], [0, 0, 1, 1], [], []>} : vector<8x128xbf16>, vector<128x512xbf16>, vector<8x512xf32> -> vector<8x512xf32>
    %11 = arith.addf %7, %10 : vector<8x512xf32>
    %c0_10 = arith.constant 0 : index
    %c0_11 = arith.constant 0 : index
    %12 = vector.load %arg5[%c0_10, %c0_11] : memref<1x512xf32, #tpu.memory_space<vmem>>, vector<1x512xf32>
    %13 = vector.broadcast %12 : vector<1x512xf32> to vector<8x512xf32>
    %14 = arith.addf %11, %13 : vector<8x512xf32>
    %15 = vector.extract_strided_slice %14 {offsets = [0, 0], sizes = [8, 128], strides = [1, 1]} : vector<8x512xf32> to vector<8x128xf32>
    %16 = arith.negf %15 : vector<8x128xf32>
    %17 = math.exp %16 : vector<8x128xf32>
    %cst_12 = arith.constant 1.000000e+00 : f32
    %18 = vector.broadcast %cst_12 : f32 to vector<8x128xf32>
    %19 = arith.addf %18, %17 : vector<8x128xf32>
    %20 = arith.divf %18, %19 : vector<8x128xf32>
    %21 = vector.extract_strided_slice %14 {offsets = [0, 128], sizes = [8, 128], strides = [1, 1]} : vector<8x512xf32> to vector<8x128xf32>
    %22 = arith.negf %21 : vector<8x128xf32>
    %23 = math.exp %22 : vector<8x128xf32>
    %cst_13 = arith.constant 1.000000e+00 : f32
    %24 = vector.broadcast %cst_13 : f32 to vector<8x128xf32>
    %25 = arith.addf %24, %23 : vector<8x128xf32>
    %26 = arith.divf %24, %25 : vector<8x128xf32>
    %27 = vector.extract_strided_slice %14 {offsets = [0, 256], sizes = [8, 128], strides = [1, 1]} : vector<8x512xf32> to vector<8x128xf32>
    %28 = math.tanh %27 : vector<8x128xf32>
    %29 = vector.extract_strided_slice %14 {offsets = [0, 384], sizes = [8, 128], strides = [1, 1]} : vector<8x512xf32> to vector<8x128xf32>
    %30 = arith.negf %29 : vector<8x128xf32>
    %31 = math.exp %30 : vector<8x128xf32>
    %cst_14 = arith.constant 1.000000e+00 : f32
    %32 = vector.broadcast %cst_14 : f32 to vector<8x128xf32>
    %33 = arith.addf %32, %31 : vector<8x128xf32>
    %34 = arith.divf %32, %33 : vector<8x128xf32>
    %c0_15 = arith.constant 0 : index
    %c0_16 = arith.constant 0 : index
    %35 = vector.load %arg8[%c0_15, %c0_16] : memref<8x128xf32, #tpu.memory_space<vmem>>, vector<8x128xf32>
    %36 = arith.mulf %26, %35 : vector<8x128xf32>
    %37 = arith.mulf %20, %28 : vector<8x128xf32>
    %38 = arith.addf %36, %37 : vector<8x128xf32>
    %39 = math.tanh %38 : vector<8x128xf32>
    %40 = arith.mulf %34, %39 : vector<8x128xf32>
    %c0_17 = arith.constant 0 : index
    %c0_18 = arith.constant 0 : index
    %41 = vector.load %arg8[%c0_17, %c0_18] : memref<8x128xf32, #tpu.memory_space<vmem>>, vector<8x128xf32>
    tpu.vector_store %arg8[%c0_17, %c0_18], %38 {strides = array<i32>} : memref<8x128xf32, #tpu.memory_space<vmem>>, vector<8x128xf32>,
    %c0_19 = arith.constant 0 : index
    %c0_20 = arith.constant 0 : index
    %42 = vector.load %arg7[%c0_19, %c0_20] : memref<8x128xf32, #tpu.memory_space<vmem>>, vector<8x128xf32>
    tpu.vector_store %arg7[%c0_19, %c0_20], %40 {strides = array<i32>} : memref<8x128xf32, #tpu.memory_space<vmem>>, vector<8x128xf32>,
    %c7_i32 = arith.constant 7 : i32
    %43 = arith.cmpi eq, %arg1, %c7_i32 : i32
    %44 = arith.extui %43 : i1 to i32
    %c0_i32_21 = arith.constant 0 : i32
    %45 = arith.cmpi ne, %44, %c0_i32_21 : i32
    scf.if %45 {
      %c0_22 = arith.constant 0 : index
      %c0_23 = arith.constant 0 : index
      %46 = vector.load %arg6[%c0_22, %c0_23] : memref<8x128xf32, #tpu.memory_space<vmem>>, vector<8x128xf32>
      tpu.vector_store %arg6[%c0_22, %c0_23], %40 {strides = array<i32>} : memref<8x128xf32, #tpu.memory_space<vmem>>, vector<8x128xf32>,
    } else {
    }
    return
  }
  func.func @transform_0(%arg0: i32, %arg1: i32) -> (i32, i32, i32) {
    %c0_i32 = arith.constant 0 : i32
    %c0_i32_0 = arith.constant 0 : i32
    return %arg1, %arg0, %c0_i32 : i32, i32, i32
  }
  func.func @transform_1(%arg0: i32, %arg1: i32) -> (i32, i32) {
    %c0_i32 = arith.constant 0 : i32
    %c0_i32_0 = arith.constant 0 : i32
    %c0_i32_1 = arith.constant 0 : i32
    return %c0_i32, %c0_i32_0 : i32, i32
  }
  func.func @transform_2(%arg0: i32, %arg1: i32) -> (i32, i32) {
    %c0_i32 = arith.constant 0 : i32
    %c0_i32_0 = arith.constant 0 : i32
    %c0_i32_1 = arith.constant 0 : i32
    return %c0_i32, %c0_i32_0 : i32, i32
  }
  func.func @transform_3(%arg0: i32, %arg1: i32) -> (i32, i32) {
    %c0_i32 = arith.constant 0 : i32
    %c0_i32_0 = arith.constant 0 : i32
    %c0_i32_1 = arith.constant 0 : i32
    return %c0_i32, %c0_i32_0 : i32, i32
  }
  func.func @transform_4(%arg0: i32, %arg1: i32) -> (i32, i32) {
    %c0_i32 = arith.constant 0 : i32
    %c0_i32_0 = arith.constant 0 : i32
    return %arg0, %c0_i32 : i32, i32
  }
}

</mosaic_0001>

<bundles_post_ra>
// kernel: tpu_custom_call.1
= control target key start
LH: loop header
LB: loop body
LE: loop exit
PB: predicated region body
PF: predicated region fallthrough
CT: control target
= control target key end

     0   :  { %9 = vsyncpa [#allocation5], 0  ;;  %s1598_s0 = inlined_call_operand.hbm [shape: bf16[8,8,128], index: 0, kind: input, shape index: {}]   ;;  %s1599_s1 = inlined_call_operand.hbm [shape: bf16[128,512], index: 1, kind: input, shape index: {}]   ;;  %s1600_s2 = inlined_call_operand.hbm [shape: bf16[128,512], index: 2, kind: input, shape index: {}]   ;;  %s1601_s3 = inlined_call_operand.vmem [shape: f32[1,512], index: 3, kind: input, shape index: {}]   ;;  %s1602_s4 = inlined_call_operand.hbm [shape: f32[8,128], index: 4, kind: output, shape index: {}]  }
   0x1   :  { %11 = vsyncpa [#allocation5 + $0x1], 0 }
   0x2   :  { %12 = vsyncpa [#allocation8], 0 }
   0x3   :  { %13 = vsyncpa [#allocation6], 0  ;;  %s1436_s15 = smov 0   ;;  %s1438_s16 = smov 0  }
   0x4   :  { %s1440_s17 = smov 0   ;;  %s1442_s18 = smov 0  }
   0x5   :  { %s1444_s19 = smov 0   ;;  %s1446_s20 = smov 0  }
   0x6 LB: > { %s956_s21 = sadd.s32 4294967295, %s1401_s20   ;;  %p53_p0 = scmp.ne.s32.totalorder %s1385_s16, %s1381_s15  ;;  %s1401_s20 = sphi %s1446_s20, %s19_s20   ;;  %s1397_s19 = sphi %s1444_s19, %s1616_s19   ;;  %s1393_s18 = sphi %s1442_s18, %s1615_s18   ;;  %s1389_s17 = sphi %s1440_s17, %s1614_s17   ;;  %s1385_s16 = sphi %s1438_s16, %s1613_s16   ;;  %s1381_s15 = sphi %s1436_s15, %s1612_s15  }
   0x7   : > { %p1468_p1 = scmp.eq.s32.totalorder %s956_s21, 0  ;;  %p957_p2 = scmp.ge.s32.totalorder %s1401_s20, 1 }
   0x8   : > { %p153_p3 = scmp.lt.s32.totalorder %s1401_s20, 9  ;;  %s1403_s25 = smov [#allocation7]  }
   0x9   : > { %s1605_s22 = scalar_select %p1468_p1, 1, 0 }
   0xa   : > { %p1476_p4 = por %p1468_p1, %p53_p0  ;;  %p1480_p5 = pnand %p957_p2, %p153_p3 }
   0xb   : > { %s165_s26 = sshll.u32 %s1403_s25, 4  ;;  %s1404_s28 = smov [#allocation9]   ;;  %s166_s26 = int_to_ptr.vmem [resolvable:$true] %s165_s26 }
   0xc   : > { %p1054_p6 = pneg %p1480_p5  ;;  %s178_s29 = sshll.u32 %s1404_s28, 4  ;;  %s179_s29 = int_to_ptr.vmem [resolvable:$true] %s178_s29 }
   0xd   : > { %s1250_s30 = scalar_lea.vmem %s166_s26, 4096  ;;  %p1258_p12 = scmp.lt.s32.totalorder %s166_s26, %s166_s26 }
   0xe   : > { %p1488_p7 = pnand %p1054_p6, %p1468_p1  ;;  %p1251_p9 = scmp.ne.s32.totalorder %s166_s26, %s1250_s30 }
   0xf   : > { %p1259_p13 = scmp.lt.s32.totalorder %s1250_s30, %s1250_s30 }
  0x10   : > { %p1241_p8 = pneg %p1488_p7 }
  0x11   : > { %p1260_p0 = por %p1259_p13, %p1258_p12 }
  0x12   : > { %p1253_p10 = pnand %p1251_p9, %p1241_p8 }
  0x14   : > { %p1254_p11 = pneg %p1253_p10 }
  0x16   : > { %p1261_p2 = pnand %p1260_p0, %p1254_p11 }
  0x18   : > { %1264 = shalt.err (!%p1261_p2)
}
  0x19   : > { %s1405_s5 = smov 256   ;;  %s1406_s6 = smov 16  }
  0x1a   : > { %1057 = dma.hbm_to_vmem [thread:$0]  (!%p1488_p7), %s1599_s1, 4096, %s166_s26, [#allocation8], %s1405_s5, %s1405_s5, %s1406_s6  }
  0x1b   : > { %s1276_s9 = scalar_lea.vmem %s179_s29, 4096  ;;  %p1284_p10 = scmp.lt.s32.totalorder %s179_s29, %s179_s29 }
  0x1c   : > { %p1277_p3 = scmp.ne.s32.totalorder %s179_s29, %s1276_s9  ;;  %p1285_p1 = scmp.lt.s32.totalorder %s1276_s9, %s1276_s9 }
  0x1e   : > { %p1279_p6 = pnand %p1277_p3, %p1241_p8  ;;  %p1286_p12 = por %p1285_p1, %p1284_p10 }
  0x20   : > { %p1280_p9 = pneg %p1279_p6 }
  0x22   : > { %p1287_p11 = pnand %p1286_p12, %p1280_p9 }
  0x24   : > { %1290 = shalt.err (!%p1287_p11)
}
  0x25   : > { %1060 = dma.hbm_to_vmem [thread:$0]  (!%p1488_p7), %s1600_s2, 4096, %s179_s29, [#allocation8], %s1405_s5, %s1405_s5, %s1406_s6  }
  0x26   : > { %s28_s12 = sadd.s32 1, %s1397_s19  ;;  %s40_s13 = sadd.s32 1, %s1389_s17 }
  0x27   : > { %p29_p1 = scmp.ge.s32.totalorder %s28_s12, 8  ;;  %p47_p8 = scmp.ne.s32.totalorder %s1389_s17, %s1385_s16 }
  0x28   : > { %p48_p13 = scmp.eq.s32.totalorder %s1401_s20, 0  ;;  %p1067_p0 = scmp.lt.s32.totalorder %s1401_s20, 8 }
  0x29   : > { %s1618_s12 = smov (%p29_p1, %s28_s12), 0  ;;  %s195_s14 = sand.u32 1, %s1389_s17  }
  0x2a   : > { %p49_p2 = por %p48_p13, %p47_p8  ;;  %s35_s15 = ssub.s32 %s1397_s19, %s1618_s12 }
  0x2b   : > { %p38_p3 = scmp.eq.s32.totalorder %s35_s15, 0  ;;  %s961_s25 = sshll.u32 %s195_s14, 2 }
  0x2c   : > { %s962_s26 = sshll.u32 %s1397_s19, 6  ;;  %s199_s5 = scalar_lea.vmem [#allocation4], %s961_s25 }
  0x2d   : > { %s1523_s27 = scalar_select %p38_p3, %s1389_s17, %s40_s13  }
  0x2e   : > { %s205_s30 = scalar_lea.hbm %s1598_s0, %s962_s26  ;;  %s207_s6 = sshll.u32 %s199_s5, 4  ;;  %s208_s6 = int_to_ptr.vmem [resolvable:$true] %s207_s6 }
  0x2f   : > { %p1530_p7 = pnand %p1067_p0, %p49_p2  ;;  %s196_s8 = scalar_lea.sflag [#allocation5], %s195_s14 }
  0x30   : > { %s1304_s9 = scalar_lea.vmem %s208_s6, 64  ;;  %s1407_s10 = smov [#allocation4]  }
  0x31   : > { %p1293_p6 = pneg %p1530_p7  ;;  %p1305_p9 = scmp.ne.s32.totalorder %s208_s6, %s1304_s9 }
  0x32   : > { %s1309_s11 = sshll.u32 %s1407_s10, 4  ;;  %s1310_s11 = int_to_ptr.vmem [resolvable:$false] %s1309_s11 }
  0x33   : > { %p1307_p10 = pnand %p1305_p9, %p1293_p6  ;;  %s1311_s13 = scalar_lea.vmem %s1310_s11, 128 }
  0x34   : > { %p1312_p11 = scmp.lt.s32.totalorder %s208_s6, %s1310_s11  ;;  %p1313_p1 = scmp.lt.s32.totalorder %s1311_s13, %s1304_s9 }
  0x35   : > { %p1308_p12 = pneg %p1307_p10 }
  0x36   : > { %p1314_p8 = por %p1313_p1, %p1312_p11 }
  0x38   : > { %p1315_p13 = pnand %p1314_p8, %p1308_p12 }
  0x3a   : > { %1318 = shalt.err (!%p1315_p13)
}
  0x3b   : > { %1064 = dma.hbm_to_vmem [thread:$0]  (!%p1530_p7), %s205_s30, 64, %s208_s6, %s196_s8  }
  0x3c   : > { %216 = sbr.rel (%p1480_p5) target bundleno = 412 (0x19c), region = 36  ;;  %s218_s14 = sand.u32 (!%p1480_p5), 1, %s1385_s16  }
  0x3d   : > { %s1541_s15 = sshll.u32 (!%p1480_p5), %s218_s14, 2  ;;  %s219_s25 = scalar_lea.sflag (!%p1480_p5), [#allocation5], %s218_s14 }
  0x3e   : > { %s222_s26 = scalar_lea.vmem (!%p1480_p5), [#allocation4], %s1541_s15 }
  0x41   : > { %1368 = dma.done.wait (%p1476_p4), %s219_s25, 64  }
  0x42   : > { %1370 = vsyncadd (%p1476_p4), %s219_s25, 4294967232  ;;  %p1610_p0 = scmp.ne.s32.totalorder %s1605_s22, 0 }
  0x44   : > { %1372 = dma.done.wait (%p1610_p0), [#allocation8], 8192  }
  0x45   : > { %1374 = vsyncadd (%p1610_p0), [#allocation8], 4294959104  ;;  %p967_p5 = scmp.ne.s32.totalorder %s1393_s18, 0 }
  0x47   : > { %254 = sbr.rel (%p967_p5) target bundleno = 78 (0x4e), region = 52 }
  0x4c   : > { %v1408_v0 = vmov 0.0  }
  0x4d   : > { %255 = vst [vmem:[#allocation2] sm:$0xff] %v1408_v0  ;;  %256 = vst [vmem:[#allocation3] sm:$0xff] %v1408_v0 }
  0x4e PF: > { %v1127_v1 = vld [vmem:[#allocation9 + $0xe4] ss:$16 sps:$4 sm:$0xff]   ;;  %v1129_v2 = vld [vmem:[#allocation9 + $0xec] ss:$16 sps:$4 sm:$0xff]   ;;  %v1409_v3 = vmov 0   ;;  %p1035_p4 = scmp.ne.s32.totalorder %s1393_s18, 7 }
  0x4f   : > { %516 = vmatprep.mubr.bf16.mxu0 %v1409_v3  ;;  %557 = vmatprep.mubr.bf16.mxu1 %v1409_v3  ;;  %v1131_v4 = vld [vmem:[#allocation9 + $0xe0] ss:$16 sps:$4 sm:$0xff]   ;;  %v1132_v5 = vld [vmem:[#allocation9 + $0xe8] ss:$16 sps:$4 sm:$0xff]   ;;  %v1133_v6 = vld [vmem:[#allocation9 + $0xc4] ss:$16 sps:$4 sm:$0xff]  }
  0x50   : > { %484 = vmatprep.subr.bf16.mxu0 %v1127_v1  ;;  %525 = vmatprep.subr.bf16.mxu1 %v1129_v2  ;;  %v1135_v7 = vld [vmem:[#allocation9 + $0xcc] ss:$16 sps:$4 sm:$0xff]   ;;  %v1137_v8 = vld [vmem:[#allocation9 + $0xc0] ss:$16 sps:$4 sm:$0xff]   ;;  %v1138_v9 = vld [vmem:[#allocation9 + $0xc8] ss:$16 sps:$4 sm:$0xff]  }
  0x51   : > { %485 = vmatpush1.bf16.msra.mxu0 %v1131_v4  ;;  %526 = vmatpush1.bf16.msra.mxu1 %v1132_v5  ;;  %v1139_v10 = vld [vmem:[#allocation9 + $0xa4] ss:$16 sps:$4 sm:$0xff]   ;;  %v1141_v11 = vld [vmem:[#allocation9 + $0xac] ss:$16 sps:$4 sm:$0xff]   ;;  %v1143_v12 = vld [vmem:[#allocation9 + $0xa0] ss:$16 sps:$4 sm:$0xff]  }
  0x52   : > { %486 = vmatprep.subr.bf16.mxu0 %v1133_v6  ;;  %527 = vmatprep.subr.bf16.mxu1 %v1135_v7  ;;  %v1144_v13 = vld [vmem:[#allocation9 + $0xa8] ss:$16 sps:$4 sm:$0xff]   ;;  %v1145_v14 = vld [vmem:[#allocation9 + $0x84] ss:$16 sps:$4 sm:$0xff]   ;;  %v1147_v15 = vld [vmem:[#allocation9 + $0x8c] ss:$16 sps:$4 sm:$0xff]  }
  0x53   : > { %v1149_v16 = vld [vmem:[#allocation9 + $0x80] ss:$16 sps:$4 sm:$0xff]   ;;  %v1150_v17 = vld [vmem:[#allocation9 + $0x88] ss:$16 sps:$4 sm:$0xff]   ;;  %v1151_v18 = vld [vmem:[#allocation9 + $0x64] ss:$16 sps:$4 sm:$0xff]  }
  0x54   : > { %v1153_v19 = vld [vmem:[#allocation9 + $0x6c] ss:$16 sps:$4 sm:$0xff]   ;;  %v1155_v20 = vld [vmem:[#allocation9 + $0x60] ss:$16 sps:$4 sm:$0xff]   ;;  %v1156_v21 = vld [vmem:[#allocation9 + $0x68] ss:$16 sps:$4 sm:$0xff]  }
  0x55   : > { %487 = vmatpush1.bf16.msra.mxu0 %v1137_v8  ;;  %528 = vmatpush1.bf16.msra.mxu1 %v1138_v9  ;;  %v1157_v22 = vld [vmem:[#allocation9 + $0x44] ss:$16 sps:$4 sm:$0xff]   ;;  %v1159_v23 = vld [vmem:[#allocation9 + $0x4c] ss:$16 sps:$4 sm:$0xff]   ;;  %v1161_v24 = vld [vmem:[#allocation9 + $0x40] ss:$16 sps:$4 sm:$0xff]  }
  0x56   : > { %488 = vmatprep.subr.bf16.mxu0 %v1139_v10  ;;  %529 = vmatprep.subr.bf16.mxu1 %v1141_v11  ;;  %v1162_v25 = vld [vmem:[#allocation9 + $0x48] ss:$16 sps:$4 sm:$0xff]   ;;  %v1163_v26 = vld [vmem:[#allocation9 + $0x24] ss:$16 sps:$4 sm:$0xff]   ;;  %v1165_v27 = vld [vmem:[#allocation9 + $0x2c] ss:$16 sps:$4 sm:$0xff]  }
  0x57   : > { %v1167_v28 = vld [vmem:[#allocation9 + $0x20] ss:$16 sps:$4 sm:$0xff]   ;;  %v1168_v29 = vld [vmem:[#allocation9 + $0x28] ss:$16 sps:$4 sm:$0xff]   ;;  %v1169_v30 = vld [vmem:[#allocation9 + $0x4] ss:$16 sps:$4 sm:$0xff]  }
  0x58   : > { %v1171_v31 = vld [vmem:[#allocation9 + $0xc] ss:$16 sps:$4 sm:$0xff]   ;;  %v1173_v32 = vld [vmem:[#allocation9] ss:$16 sps:$4 sm:$0xff]   ;;  %v1174_v33 = vld [vmem:[#allocation9 + $0x8] ss:$16 sps:$4 sm:$0xff]  }
  0x59   : > { %489 = vmatpush1.bf16.msra.mxu0 %v1143_v12  ;;  %530 = vmatpush1.bf16.msra.mxu1 %v1144_v13  ;;  %v258_v34 = vld [vmem:[#allocation2] sm:$0xff]  ;;  %v1177_v35 = vld [vmem:[#allocation7 + $0xe4] ss:$16 sps:$4 sm:$0xff]   ;;  %v1175_v38 = vld [vmem:[#allocation7 + $0xe0] ss:$16 sps:$4 sm:$0xff]   ;;  %v810_v13 = vlaneseq }
  0x5a   : > { %490 = vmatprep.subr.bf16.mxu0 %v1145_v14  ;;  %531 = vmatprep.subr.bf16.mxu1 %v1147_v15  ;;  %v1180_v36 = vld [vmem:[#allocation7 + $0xec] ss:$16 sps:$4 sm:$0xff]   ;;  %v291_v37 = vpack.c.bf16 %v258_v34, %v258_v34  ;;  %v1178_v39 = vld [vmem:[#allocation7 + $0xe8] ss:$16 sps:$4 sm:$0xff]   ;;  %v1183_v40 = vld [vmem:[#allocation7 + $0xc4] ss:$16 sps:$4 sm:$0xff]  }
  0x5b   : > { %v1186_v41 = vld [vmem:[#allocation7 + $0xcc] ss:$16 sps:$4 sm:$0xff]   ;;  %v1181_v42 = vld [vmem:[#allocation7 + $0xc0] ss:$16 sps:$4 sm:$0xff]   ;;  %v1184_v43 = vld [vmem:[#allocation7 + $0xc8] ss:$16 sps:$4 sm:$0xff]  }
  0x5c   : > { %v1189_v44 = vld [vmem:[#allocation7 + $0xa4] ss:$16 sps:$4 sm:$0xff]   ;;  %v1192_v45 = vld [vmem:[#allocation7 + $0xac] ss:$16 sps:$4 sm:$0xff]   ;;  %v1187_v46 = vld [vmem:[#allocation7 + $0xa0] ss:$16 sps:$4 sm:$0xff]  }
  0x5d   : > { %491 = vmatpush1.bf16.msra.mxu0 %v1149_v16  ;;  %532 = vmatpush1.bf16.msra.mxu1 %v1150_v17  ;;  %v1190_v47 = vld [vmem:[#allocation7 + $0xa8] ss:$16 sps:$4 sm:$0xff]   ;;  %v1195_v48 = vld [vmem:[#allocation7 + $0x84] ss:$16 sps:$4 sm:$0xff]   ;;  %v1198_v49 = vld [vmem:[#allocation7 + $0x8c] ss:$16 sps:$4 sm:$0xff]  }
  0x5e   : > { %492 = vmatprep.subr.bf16.mxu0 %v1151_v18  ;;  %533 = vmatprep.subr.bf16.mxu1 %v1153_v19  ;;  %v1193_v50 = vld [vmem:[#allocation7 + $0x80] ss:$16 sps:$4 sm:$0xff]   ;;  %v1196_v51 = vld [vmem:[#allocation7 + $0x88] ss:$16 sps:$4 sm:$0xff]   ;;  %v1201_v52 = vld [vmem:[#allocation7 + $0x64] ss:$16 sps:$4 sm:$0xff]  }
  0x5f   : > { %v1204_v53 = vld [vmem:[#allocation7 + $0x6c] ss:$16 sps:$4 sm:$0xff]   ;;  %v1199_v54 = vld [vmem:[#allocation7 + $0x60] ss:$16 sps:$4 sm:$0xff]   ;;  %v1202_v55 = vld [vmem:[#allocation7 + $0x68] ss:$16 sps:$4 sm:$0xff]  }
  0x60   : > { %v1207_v56 = vld [vmem:[#allocation7 + $0x44] ss:$16 sps:$4 sm:$0xff]   ;;  %v1210_v57 = vld [vmem:[#allocation7 + $0x4c] ss:$16 sps:$4 sm:$0xff]   ;;  %v1205_v58 = vld [vmem:[#allocation7 + $0x40] ss:$16 sps:$4 sm:$0xff]  }
  0x61   : > { %493 = vmatpush1.bf16.msra.mxu0 %v1155_v20  ;;  %534 = vmatpush1.bf16.msra.mxu1 %v1156_v21  ;;  %v1208_v59 = vld [vmem:[#allocation7 + $0x48] ss:$16 sps:$4 sm:$0xff]   ;;  %v1213_v60 = vld [vmem:[#allocation7 + $0x24] ss:$16 sps:$4 sm:$0xff]   ;;  %v1216_v61 = vld [vmem:[#allocation7 + $0x2c] ss:$16 sps:$4 sm:$0xff]  }
  0x62   : > { %494 = vmatprep.subr.bf16.mxu0 %v1157_v22  ;;  %535 = vmatprep.subr.bf16.mxu1 %v1159_v23  ;;  %v1211_v62 = vld [vmem:[#allocation7 + $0x20] ss:$16 sps:$4 sm:$0xff]   ;;  %v1214_v63 = vld [vmem:[#allocation7 + $0x28] ss:$16 sps:$4 sm:$0xff]   ;;  %v1219_v0 = vld [vmem:[#allocation7 + $0x4] ss:$16 sps:$4 sm:$0xff]  }
  0x63   : > { %v1222_v1 = vld [vmem:[#allocation7 + $0xc] ss:$16 sps:$4 sm:$0xff]   ;;  %v1217_v2 = vld [vmem:[#allocation7] ss:$16 sps:$4 sm:$0xff]   ;;  %v811_v14 = vshrl.u32 %v810_v13, 7 }
  0x64   : > { %v257_v4 = vld [vmem:[%s222_s26] sm:$0xf]  ;;  %v808_v16 = vld [vmem:[%s1601_s3] sm:$0xf] }
  0x65   : > { %495 = vmatpush1.bf16.msra.mxu0 %v1161_v24  ;;  %536 = vmatpush1.bf16.msra.mxu1 %v1162_v25  ;;  %v812_v15 = vsub.s32 0, %v811_v14  ;;  %v816_v17 = vsub.s32 1, %v811_v14 }
  0x66   : > { %496 = vmatprep.subr.bf16.mxu0 %v1163_v26  ;;  %537 = vmatprep.subr.bf16.mxu1 %v1165_v27 }
  0x67   : > { %v813_v18 = vrot.slane %v808_v16, %v812_v15  ;;  %v817_v22 = vrot.slane %v808_v16, %v816_v17 }
  0x69   : > { %497 = vmatpush1.bf16.msra.mxu0 %v1167_v28  ;;  %538 = vmatpush1.bf16.msra.mxu1 %v1168_v29 }
  0x6a   : > { %498 = vmatprep.subr.bf16.mxu0 %v1169_v30  ;;  %539 = vmatprep.subr.bf16.mxu1 %v1171_v31  ;;  %v824_v31 = vsub.s32 3, %v811_v14 }
  0x6d   : > { %499 = vmatpush1.bf16.msra.mxu0 %v1173_v32  ;;  %540 = vmatpush1.bf16.msra.mxu1 %v1174_v33 }
  0x6e   : > { %726 = vmatprep.subr.bf16.mxu0 %v1177_v35  ;;  %767 = vmatprep.subr.bf16.mxu1 %v1180_v36  ;;  %v825_v36 = vrot.slane %v808_v16, %v824_v31 }
  0x70   : > { %517 = vmatmul.mubr.bf16.vlgmr.msra.gmra.mxu0 %v291_v37  ;;  %558 = vmatmul.mubr.bf16.vlgmr.msra.gmra.mxu1 %v291_v37  ;;  %v820_v37 = vsub.s32 2, %v811_v14 }
  0x71   : > { %727 = vmatpush1.bf16.msra.mxu0 %v1175_v38  ;;  %768 = vmatpush1.bf16.msra.mxu1 %v1178_v39 }
  0x72   : > { %728 = vmatprep.subr.bf16.mxu0 %v1183_v40  ;;  %769 = vmatprep.subr.bf16.mxu1 %v1186_v41  ;;  %v821_v40 = vrot.slane %v808_v16, %v820_v37 }
  0x73   : > { %758 = vmatprep.mubr.bf16.mxu0 %v1409_v3  ;;  %799 = vmatprep.mubr.bf16.mxu1 %v1409_v3  ;;  %v1220_v3 = vld [vmem:[#allocation7 + $0x8] ss:$16 sps:$4 sm:$0xff]  }
  0x75   : > { %729 = vmatpush1.bf16.msra.mxu0 %v1181_v42  ;;  %770 = vmatpush1.bf16.msra.mxu1 %v1184_v43 }
  0x76   : > { %730 = vmatprep.subr.bf16.mxu0 %v1189_v44  ;;  %771 = vmatprep.subr.bf16.mxu1 %v1192_v45 }
  0x79   : > { %731 = vmatpush1.bf16.msra.mxu0 %v1187_v46  ;;  %772 = vmatpush1.bf16.msra.mxu1 %v1190_v47 }
  0x7a   : > { %732 = vmatprep.subr.bf16.mxu0 %v1195_v48  ;;  %773 = vmatprep.subr.bf16.mxu1 %v1198_v49  ;;  %v853_v49 = vld [vmem:[#allocation3] sm:$0xff] }
  0x7d   : > { %733 = vmatpush1.bf16.msra.mxu0 %v1193_v50  ;;  %774 = vmatpush1.bf16.msra.mxu1 %v1196_v51 }
  0x7e   : > { %734 = vmatprep.subr.bf16.mxu0 %v1201_v52  ;;  %775 = vmatprep.subr.bf16.mxu1 %v1204_v53 }
  0x81   : > { %735 = vmatpush1.bf16.msra.mxu0 %v1199_v54  ;;  %776 = vmatpush1.bf16.msra.mxu1 %v1202_v55 }
  0x82   : > { %736 = vmatprep.subr.bf16.mxu0 %v1207_v56  ;;  %777 = vmatprep.subr.bf16.mxu1 %v1210_v57 }
  0x85   : > { %737 = vmatpush1.bf16.msra.mxu0 %v1205_v58  ;;  %778 = vmatpush1.bf16.msra.mxu1 %v1208_v59 }
  0x86   : > { %738 = vmatprep.subr.bf16.mxu0 %v1213_v60  ;;  %779 = vmatprep.subr.bf16.mxu1 %v1216_v61 }
  0x89   : > { %739 = vmatpush1.bf16.msra.mxu0 %v1211_v62  ;;  %780 = vmatpush1.bf16.msra.mxu1 %v1214_v63 }
  0x8a   : > { %740 = vmatprep.subr.bf16.mxu0 %v1219_v0  ;;  %781 = vmatprep.subr.bf16.mxu1 %v1222_v1 }
  0x8d   : > { %741 = vmatpush1.bf16.msra.mxu0 %v1217_v2  ;;  %782 = vmatpush1.bf16.msra.mxu1 %v1220_v3 }
  0x90   : > { %759 = vmatmul.mubr.bf16.vlgmr.msra.gmra.mxu0 %v257_v4  ;;  %800 = vmatmul.mubr.bf16.vlgmr.msra.gmra.mxu1 %v257_v4 }
 0x130   : > { %v518_v5 = vpop.f32.mrf.mxu0  ;;  %v559_v6 = vpop.f32.mrf.mxu1 }
 0x132   : > { %v520_v7 = vpop.f32.mrf.mxu0  ;;  %v561_v8 = vpop.f32.mrf.mxu1 }
 0x134   : > { %v522_v9 = vpop.f32.mrf.mxu0  ;;  %v563_v10 = vpop.f32.mrf.mxu1 }
 0x136   : > { %v523_v11 = vpop.f32.mrf.mxu0  ;;  %v564_v12 = vpop.f32.mrf.mxu1 }
 0x150   : > { %v760_v19 = vpop.f32.mrf.mxu0  ;;  %v801_v20 = vpop.f32.mrf.mxu1 }
 0x151   : > { %v761_v21 = vadd.f32 %v760_v19, %v518_v5  ;;  %v802_v39 = vadd.f32 %v801_v20, %v559_v6 }
 0x152   : > { %v762_v23 = vpop.f32.mrf.mxu0  ;;  %v803_v24 = vpop.f32.mrf.mxu1 }
 0x153   : > { %v830_v25 = vadd.f32 %v813_v18, %v761_v21  ;;  %v763_v26 = vadd.f32 %v762_v23, %v520_v7  ;;  %v804_v35 = vadd.f32 %v803_v24, %v561_v8  ;;  %v832_v43 = vadd.f32 %v821_v40, %v802_v39 }
 0x154   : > { %v764_v27 = vpop.f32.mrf.mxu0  ;;  %v805_v28 = vpop.f32.mrf.mxu1 }
 0x155   : > { %v1032_v29 = vmul.f32 -1.442695, %v830_v25  ;;  %v831_v30 = vadd.f32 %v817_v22, %v763_v26  ;;  %v833_v38 = vadd.f32 %v825_v36, %v804_v35 }
 0x156   : > { %v765_v32 = vpop.f32.mrf.mxu0  ;;  %v806_v33 = vpop.f32.mrf.mxu1 }
 0x157   : > { %1223 = vpow2.f32 %v1032_v29  ;;  %v1033_v34 = vmul.f32 -1.442695, %v831_v30  ;;  %v1034_v41 = vmul.f32 -1.442695, %v833_v38 }
 0x159   : > { %1225 = vpow2.f32 %v1033_v34 }
 0x15a   : > { %1227 = vpow2.f32 %v1034_v41 }
 0x164   : > { %v1224_v42 = vpop.eup %1223 }
 0x165   : > { %v837_v44 = vadd.f32 1.0, %v1224_v42 }
 0x166   : > { %v1226_v45 = vpop.eup %1225 }
 0x167   : > { %1229 = vrcp.f32 %v837_v44  ;;  %v843_v46 = vadd.f32 1.0, %v1226_v45  ;;  %v1228_v47 = vpop.eup %1227 }
 0x168   : > { %1231 = vtanh.f32 %v832_v43  ;;  %v850_v52 = vadd.f32 1.0, %v1228_v47 }
 0x169   : > { %1233 = vrcp.f32 %v843_v46 }
 0x16a   : > { %1235 = vrcp.f32 %v850_v52 }
 0x174   : > { %v1230_v48 = vpop.eup %1229 }
 0x175   : > { %v1232_v50 = vpop.eup %1231 }
 0x176   : > { %v1234_v51 = vpop.eup %1233  ;;  %v855_v53 = vmul.f32 %v1232_v50, %v1230_v48 }
 0x177   : > { %v854_v54 = vmul.f32 %v1234_v51, %v853_v49  ;;  %v1236_v56 = vpop.eup %1235 }
 0x179   : > { %v856_v55 = vadd.f32 %v855_v53, %v854_v54 }
 0x17b   : > { %1237 = vtanh.f32 %v856_v55  ;;  %859 = vst [vmem:[#allocation3] sm:$0xff] %v856_v55 }
 0x187   : > { %864 = sbr.rel (%p1035_p4) target bundleno = 397 (0x18d), region = 56 }
 0x188   : > { %v1238_v57 = vpop.eup %1237 }
 0x189   : > { %v858_v58 = vmul.f32 %v1238_v57, %v1236_v56 }
 0x18b   : > { %860 = vst [vmem:[#allocation2] sm:$0xff] %v858_v58 }
 0x18c   : > { %865 = vst [vmem:[#allocation10] sm:$0xff] %v858_v58 }
 0x18d PF: > { %p1565_p2 = scmp.eq.s32.totalorder %s956_s21, 7  ;;  %s1410_s28 = smov [#allocation10]  }
 0x18e   : > { %s875_s29 = sshll.u32 %s1410_s28, 4  ;;  %s876_s29 = int_to_ptr.vmem [resolvable:$true] %s875_s29 }
 0x18f   : > { %s1319_s30 = scalar_lea.vmem %s876_s29, 128  ;;  %p1326_p9 = scmp.lt.s32.totalorder %s876_s29, %s876_s29 }
 0x190   : > { %p1320_p3 = scmp.ne.s32.totalorder %s876_s29, %s1319_s30  ;;  %p1327_p10 = scmp.lt.s32.totalorder %s1319_s30, %s1319_s30 }
 0x192   : > { %p1321_p7 = pnand %p1320_p3, %p1565_p2  ;;  %p1328_p12 = por %p1327_p10, %p1326_p9 }
 0x194   : > { %p1322_p6 = pneg %p1321_p7 }
 0x196   : > { %p1329_p11 = pnand %p1328_p12, %p1322_p6 }
 0x198   : > { %1332 = shalt.err (!%p1329_p11)
}
 0x199   : > { %1051 = dma.vmem_to_hbm [thread:$0]  (%p1565_p2), %s876_s29, 128, %s1602_s4, [#allocation6]  }
 0x19a   : > { %1376 = dma.done.wait (%p1565_p2), [#allocation6], 128  }
 0x19b   : > { %1378 = vsyncadd (%p1565_p2), [#allocation6], 4294967168 }
 0x19c PF: > { %s19_s20 = sadd.s32 1, %s1401_s20   ;;  %s1612_s15 = smov %s1385_s16 }
 0x19d   : > { %p16_p1 = scmp.ge.s32.totalorder %s19_s20, 10   ;;  %s1613_s16 = smov %s1389_s17 }
 0x19e   : > { %s1614_s17 = smov %s1523_s27  ;;  %s1615_s18 = smov %s1397_s19 }
 0x19f   : > { %s1616_s19 = smov %s1618_s12  ;;  %18 = sbr.rel (!%p16_p1) target bundleno = 6 (0x6), region = 90 }
 0x1a4   :  { %888 = vsyncpa [#allocation5], 1 }
 0x1a5   :  { %890 = vsyncpa [#allocation5 + $0x1], 1 }
 0x1a6   :  { %891 = vsyncpa [#allocation8], 1 }
 0x1a7   :  { %892 = vsyncpa [#allocation6], 1 }
 0x1a8   :  { %894 = vsyncpa [#allocation6 + $0x1], 1 }

</bundles_post_ra>
